<compile_context>
chip_gen: v7x
topology: tpu7x:2x2x1
jax: 0.10.0
libtpu: 0.0.40
codegen_flags: <defaults>
</compile_context>

<pallas_src>
import jax
import jax.numpy as jnp
from jax.experimental import pallas as pl
from jax.experimental.pallas import tpu as pltpu

INF = 1e20


def _make_kernel(has_mask: bool, L: int, D: int):
    def kernel(*refs):
        if has_mask:
            x_ref, mask_ref, w1_ref, w2_ref, out_ref = refs
        else:
            x_ref, w1_ref, w2_ref, out_ref = refs
            mask_ref = None

        x2 = x_ref[...]                                        # (TB, L*D), lane-dense

        # --- Stage 1: all L hidden vectors per batch row in one MXU matmul.
        #     w1_ref holds kron(I_L, W1) in bf16; f32 accumulation.
        h2 = jnp.tanh(
            jnp.dot(x2.astype(jnp.bfloat16), w1_ref[...],
                    preferred_element_type=jnp.float32))       # (TB, L*H) f32, dense

        # --- Stage 2: attention logits directly in a compact (TB, L) layout.
        #     w2_ref holds kron(I_L, W2) in f32 (keeps logit precision).
        att = jnp.dot(h2, w2_ref[...],
                      preferred_element_type=jnp.float32)      # (TB, L) f32

        if has_mask:
            # Positions where mask == 0 are dropped; any nonzero value keeps the
            # position.  Fully-masked rows give a uniform softmax (matches reference).
            att = jnp.where(mask_ref[...] != 0, att, -INF)

        # --- Stage 3: numerically stable softmax over L (cheap lane reduces).
        m = jnp.max(att, axis=-1, keepdims=True)               # (TB, 1)
        e = jnp.exp(att - m)                                   # (TB, L)
        s = jnp.sum(e, axis=-1, keepdims=True)                 # (TB, 1)
        probs = e * pl.reciprocal(s, approx=True)              # (TB, L), EUP divide

        # --- Stage 4: weighted pooling on the VPU, f32 accumulation, unrolled over L.
        acc = probs[:, 0:1] * x2[:, 0:D].astype(jnp.float32)   # (TB, D)
        for l in range(1, L):
            acc = acc + probs[:, l:l + 1] * x2[:, l * D:(l + 1) * D].astype(jnp.float32)

        out_ref[...] = acc.astype(out_ref.dtype)               # (TB, D) store

    return kernel


def _pick_block_b(batch: int, requested: int, gran: int) -> int:
    """Batch rows per grid step: multiple of `gran`, capped by `requested`, and
    (when possible) chosen so the grid has >= 2 steps for megacore sharding."""
    b_up = ((batch + gran - 1) // gran) * gran
    bb = max(gran, min(requested, b_up))
    bb = (bb // gran) * gran
    if bb >= b_up and b_up > gran:
        # One step would cover the whole batch; halve so both TensorCores get work.
        bb = max(gran, (((b_up // 2) + gran - 1) // gran) * gran)
    return bb


def self_attention(x, w1, w2, attention_mask=None, *, block_b=256):
    """x: (B, L, D) f32/bf16, w1: (D, H), w2: (H, 1), attention_mask: (B, L) or None.

    Returns the attention-pooled (B, D) array (dtype follows x)."""
    x = jnp.asarray(x)
    if x.dtype not in (jnp.float32, jnp.bfloat16):
        x = x.astype(jnp.float32)
    B, L, D = x.shape
    w1f = jnp.asarray(w1, jnp.float32)
    w2f = jnp.asarray(w2, jnp.float32)
    H = w1f.shape[1]

    # TODO(synk): large-L path (lane-major softmax over L tiles + MXU bf16 pooling);
    # the block-diagonal formulation below targets graphflow's short sequences.
    if L * max(D, H) > 4096:
        raise NotImplementedError("self_attention Pallas kernel targets small L*D / L*H")

    # Lane-dense view of x: trailing-dim collapse of a contiguous array is free in XLA.
    x2 = x.reshape(B, L * D)

    # Block-diagonal weights: one MXU matmul produces all L positions per batch row.
    eye = jnp.eye(L, dtype=jnp.float32)
    w1_blk = jnp.kron(eye, w1f).astype(jnp.bfloat16)           # (L*D, L*H), bf16
    w2_blk = jnp.kron(eye, w2f)                                # (L*H, L),  f32

    gran = 16 if x.dtype == jnp.bfloat16 else 8                # sublane granularity
    bb = _pick_block_b(B, block_b, gran)
    bp = pl.cdiv(B, bb) * bb
    pad = bp - B
    if pad:
        x2 = jnp.pad(x2, ((0, pad), (0, 0)))

    x_spec = pl.BlockSpec((bb, L * D), lambda b: (b, 0))
    w1_spec = pl.BlockSpec((L * D, L * H), lambda b: (0, 0))   # resident across steps
    w2_spec = pl.BlockSpec((L * H, L), lambda b: (0, 0))
    out_spec = pl.BlockSpec((bb, D), lambda b: (b, 0))

    if attention_mask is not None:
        mask = jnp.asarray(attention_mask).astype(jnp.int32).reshape(B, L)
        if pad:
            mask = jnp.pad(mask, ((0, pad), (0, 0)), constant_values=1)
        in_specs = [x_spec, pl.BlockSpec((bb, L), lambda b: (b, 0)), w1_spec, w2_spec]
        args = (x2, mask, w1_blk, w2_blk)
    else:
        # No mask: no dummy array, no extra DMA stream.
        in_specs = [x_spec, w1_spec, w2_spec]
        args = (x2, w1_blk, w2_blk)

    out = pl.pallas_call(
        _make_kernel(attention_mask is not None, L, D),
        out_shape=jax.ShapeDtypeStruct((bp, D), x.dtype),
        grid_spec=pltpu.PrefetchScalarGridSpec(
            num_scalar_prefetch=0,
            grid=(bp // bb,),
            in_specs=in_specs,
            out_specs=out_spec,
        ),
        compiler_params=pltpu.CompilerParams(
            dimension_semantics=("parallel",),
            # ~1-2 MiB of tiles at bb=256; set the scoped-VMEM budget explicitly so
            # larger blocks never trip the 16 MiB v5e default (32 MiB fits every
            # generation's physical VMEM).  If a v7x profile still shows exposed x
            # DMA, bump x_spec to pipeline_mode=pl.Buffered(3).
            vmem_limit_bytes=32 * 1024 * 1024,
        ),
    )(*args)

    return out[:B] if pad else out


def _xavier_uniform(key, shape):
    fan_in, fan_out = shape
    bound = (6.0 / (fan_in + fan_out)) ** 0.5
    return jax.random.uniform(key, shape, jnp.float32, -bound, bound)


def _reference(x, w1, w2, attention_mask=None):
    B, L, D = x.shape
    att = jnp.dot(jnp.tanh(jnp.dot(x.reshape(-1, D), w1)), w2).reshape(B, L)
    if attention_mask is not None:
        att = jnp.where(attention_mask != 0, att, -INF)
    probs = jax.nn.softmax(att, axis=-1)                       # (B, L)
    return jnp.einsum("bl,bld->bd", probs, x)                  # (B, D)


if __name__ == "__main__":
    # batch=16 (two grid steps of 8 -> even parallel axis), seq=8, input=32, hidden=32
    B, L, D, H = 16, 8, 32, 32

    key = jax.random.PRNGKey(0)
    kx, kw1, kw2 = jax.random.split(key, 3)

    x = jax.random.normal(kx, (B, L, D), dtype=jnp.float32)
    w1 = _xavier_uniform(kw1, (D, H))
    w2 = _xavier_uniform(kw2, (H, 1))

    # Deterministic attention mask: drop some positions in two batch rows.
    attention_mask = jnp.ones((B, L), dtype=jnp.int32)
    attention_mask = attention_mask.at[1, L - 2:].set(0)
    attention_mask = attention_mask.at[9, :3].set(0)

    out_masked = jax.block_until_ready(self_attention(x, w1, w2, attention_mask))
    out_nomask = jax.block_until_ready(self_attention(x, w1, w2, None))

    ref_masked = _reference(x, w1, w2, attention_mask)
    ref_nomask = _reference(x, w1, w2, None)

    assert out_masked.shape == (B, D)
    assert out_nomask.shape == (B, D)
    # bf16 MXU operands with f32 accumulation -> slightly looser tolerance vs f32 ref.
    assert jnp.allclose(out_masked, ref_masked, atol=5e-2, rtol=5e-2), "masked mismatch"
    assert jnp.allclose(out_nomask, ref_nomask, atol=5e-2, rtol=5e-2), "unmasked mismatch"

    print("KERNEL_OK")
</pallas_src>

<mosaic_0001>
module attributes {stable_mosaic.version = 11 : i64} {
  func.func @kernel(%arg0: i32, %arg1: memref<8x256xf32, #tpu.memory_space<vmem>>, %arg2: memref<8x8xi32, #tpu.memory_space<vmem>>, %arg3: memref<256x256xbf16, #tpu.memory_space<vmem>>, %arg4: memref<256x8xf32, #tpu.memory_space<vmem>>, %arg5: memref<8x32xf32, #tpu.memory_space<vmem>>) attributes {dimension_semantics = [#tpu.dimension_semantics<parallel>], iteration_bounds = array<i64: 2>, scalar_prefetch = 0 : i64, scratch_operands = 0 : i64, tpu.core_type = #tpu.core_type<tc>, window_params = [{transform_indices = @transform_0, window_bounds = array<i64: 8, 256>}, {transform_indices = @transform_1, window_bounds = array<i64: 8, 8>}, {pipeline_mode = #tpu.pipeline_mode<synchronous>, transform_indices = @transform_2, window_bounds = array<i64: 256, 256>}, {pipeline_mode = #tpu.pipeline_mode<synchronous>, transform_indices = @transform_3, window_bounds = array<i64: 256, 8>}, {transform_indices = @transform_4, window_bounds = array<i64: 8, 32>}]} {
    %c0 = arith.constant 0 : index
    %c0_0 = arith.constant 0 : index
    %0 = vector.load %arg1[%c0, %c0_0] : memref<8x256xf32, #tpu.memory_space<vmem>>, vector<8x256xf32>
    %1 = arith.truncf %0 : vector<8x256xf32> to vector<8x256xbf16>
    %c0_1 = arith.constant 0 : index
    %c0_2 = arith.constant 0 : index
    %2 = vector.load %arg3[%c0_1, %c0_2] : memref<256x256xbf16, #tpu.memory_space<vmem>>, vector<256x256xbf16>
    %cst = arith.constant dense<0.000000e+00> : vector<8x256xf32>
    %3 = tpu.matmul %1, %2, %cst {dimension_numbers = #tpu.dot_dimension_numbers<[1], [0], [0], [1], [0, 0, 1, 1], [], []>} : vector<8x256xbf16>, vector<256x256xbf16>, vector<8x256xf32> -> vector<8x256xf32>
    %4 = math.tanh %3 : vector<8x256xf32>
    %c0_3 = arith.constant 0 : index
    %c0_4 = arith.constant 0 : index
    %5 = vector.load %arg4[%c0_3, %c0_4] : memref<256x8xf32, #tpu.memory_space<vmem>>, vector<256x8xf32>
    %cst_5 = arith.constant dense<0.000000e+00> : vector<8x8xf32>
    %6 = tpu.matmul %4, %5, %cst_5 {dimension_numbers = #tpu.dot_dimension_numbers<[1], [0], [0], [1], [0, 0, 1, 1], [], []>} : vector<8x256xf32>, vector<256x8xf32>, vector<8x8xf32> -> vector<8x8xf32>
    %c0_6 = arith.constant 0 : index
    %c0_7 = arith.constant 0 : index
    %7 = vector.load %arg2[%c0_6, %c0_7] : memref<8x8xi32, #tpu.memory_space<vmem>>, vector<8x8xi32>
    %c0_i32 = arith.constant 0 : i32
    %8 = vector.broadcast %c0_i32 : i32 to vector<8x8xi32>
    %9 = arith.cmpi ne, %7, %8 : vector<8x8xi32>
    %cst_8 = arith.constant -1.000000e+20 : f32
    %10 = vector.broadcast %cst_8 : f32 to vector<8x8xf32>
    %11 = arith.select %9, %6, %10 : vector<8x8xi1>, vector<8x8xf32>
    %cst_9 = arith.constant dense<0xFF800000> : vector<8xf32>
    %12 = vector.multi_reduction <maximumf>, %11, %cst_9 [1] : vector<8x8xf32> to vector<8xf32>
    %13 = vector.shape_cast %12 : vector<8xf32> to vector<8x1xf32>
    %14 = vector.broadcast %13 : vector<8x1xf32> to vector<8x8xf32>
    %15 = arith.subf %11, %14 : vector<8x8xf32>
    %16 = math.exp %15 : vector<8x8xf32>
    %cst_10 = arith.constant dense<0.000000e+00> : vector<8xf32>
    %17 = vector.multi_reduction <add>, %16, %cst_10 [1] : vector<8x8xf32> to vector<8xf32>
    %18 = vector.shape_cast %17 : vector<8xf32> to vector<8x1xf32>
    %19 = tpu.reciprocal %18 {approx = true} : vector<8x1xf32> -> vector<8x1xf32>
    %20 = vector.broadcast %19 : vector<8x1xf32> to vector<8x8xf32>
    %21 = arith.mulf %16, %20 : vector<8x8xf32>
    %22 = vector.extract_strided_slice %21 {offsets = [0, 0], sizes = [8, 1], strides = [1, 1]} : vector<8x8xf32> to vector<8x1xf32>
    %23 = vector.extract_strided_slice %0 {offsets = [0, 0], sizes = [8, 32], strides = [1, 1]} : vector<8x256xf32> to vector<8x32xf32>
    %24 = vector.broadcast %22 : vector<8x1xf32> to vector<8x32xf32>
    %25 = arith.mulf %24, %23 : vector<8x32xf32>
    %26 = vector.extract_strided_slice %21 {offsets = [0, 1], sizes = [8, 1], strides = [1, 1]} : vector<8x8xf32> to vector<8x1xf32>
    %27 = vector.extract_strided_slice %0 {offsets = [0, 32], sizes = [8, 32], strides = [1, 1]} : vector<8x256xf32> to vector<8x32xf32>
    %28 = vector.broadcast %26 : vector<8x1xf32> to vector<8x32xf32>
    %29 = arith.mulf %28, %27 : vector<8x32xf32>
    %30 = arith.addf %25, %29 : vector<8x32xf32>
    %31 = vector.extract_strided_slice %21 {offsets = [0, 2], sizes = [8, 1], strides = [1, 1]} : vector<8x8xf32> to vector<8x1xf32>
    %32 = vector.extract_strided_slice %0 {offsets = [0, 64], sizes = [8, 32], strides = [1, 1]} : vector<8x256xf32> to vector<8x32xf32>
    %33 = vector.broadcast %31 : vector<8x1xf32> to vector<8x32xf32>
    %34 = arith.mulf %33, %32 : vector<8x32xf32>
    %35 = arith.addf %30, %34 : vector<8x32xf32>
    %36 = vector.extract_strided_slice %21 {offsets = [0, 3], sizes = [8, 1], strides = [1, 1]} : vector<8x8xf32> to vector<8x1xf32>
    %37 = vector.extract_strided_slice %0 {offsets = [0, 96], sizes = [8, 32], strides = [1, 1]} : vector<8x256xf32> to vector<8x32xf32>
    %38 = vector.broadcast %36 : vector<8x1xf32> to vector<8x32xf32>
    %39 = arith.mulf %38, %37 : vector<8x32xf32>
    %40 = arith.addf %35, %39 : vector<8x32xf32>
    %41 = vector.extract_strided_slice %21 {offsets = [0, 4], sizes = [8, 1], strides = [1, 1]} : vector<8x8xf32> to vector<8x1xf32>
    %42 = vector.extract_strided_slice %0 {offsets = [0, 128], sizes = [8, 32], strides = [1, 1]} : vector<8x256xf32> to vector<8x32xf32>
    %43 = vector.broadcast %41 : vector<8x1xf32> to vector<8x32xf32>
    %44 = arith.mulf %43, %42 : vector<8x32xf32>
    %45 = arith.addf %40, %44 : vector<8x32xf32>
    %46 = vector.extract_strided_slice %21 {offsets = [0, 5], sizes = [8, 1], strides = [1, 1]} : vector<8x8xf32> to vector<8x1xf32>
    %47 = vector.extract_strided_slice %0 {offsets = [0, 160], sizes = [8, 32], strides = [1, 1]} : vector<8x256xf32> to vector<8x32xf32>
    %48 = vector.broadcast %46 : vector<8x1xf32> to vector<8x32xf32>
    %49 = arith.mulf %48, %47 : vector<8x32xf32>
    %50 = arith.addf %45, %49 : vector<8x32xf32>
    %51 = vector.extract_strided_slice %21 {offsets = [0, 6], sizes = [8, 1], strides = [1, 1]} : vector<8x8xf32> to vector<8x1xf32>
    %52 = vector.extract_strided_slice %0 {offsets = [0, 192], sizes = [8, 32], strides = [1, 1]} : vector<8x256xf32> to vector<8x32xf32>
    %53 = vector.broadcast %51 : vector<8x1xf32> to vector<8x32xf32>
    %54 = arith.mulf %53, %52 : vector<8x32xf32>
    %55 = arith.addf %50, %54 : vector<8x32xf32>
    %56 = vector.extract_strided_slice %21 {offsets = [0, 7], sizes = [8, 1], strides = [1, 1]} : vector<8x8xf32> to vector<8x1xf32>
    %57 = vector.extract_strided_slice %0 {offsets = [0, 224], sizes = [8, 32], strides = [1, 1]} : vector<8x256xf32> to vector<8x32xf32>
    %58 = vector.broadcast %56 : vector<8x1xf32> to vector<8x32xf32>
    %59 = arith.mulf %58, %57 : vector<8x32xf32>
    %60 = arith.addf %55, %59 : vector<8x32xf32>
    %c0_11 = arith.constant 0 : index
    %c0_12 = arith.constant 0 : index
    %61 = vector.load %arg5[%c0_11, %c0_12] : memref<8x32xf32, #tpu.memory_space<vmem>>, vector<8x32xf32>
    tpu.vector_store %arg5[%c0_11, %c0_12], %60 {strides = array<i32>} : memref<8x32xf32, #tpu.memory_space<vmem>>, vector<8x32xf32>,
    return
  }
  func.func @transform_0(%arg0: i32) -> (i32, i32) {
    %c0_i32 = arith.constant 0 : i32
    %c0_i32_0 = arith.constant 0 : i32
    return %arg0, %c0_i32 : i32, i32
  }
  func.func @transform_1(%arg0: i32) -> (i32, i32) {
    %c0_i32 = arith.constant 0 : i32
    %c0_i32_0 = arith.constant 0 : i32
    return %arg0, %c0_i32 : i32, i32
  }
  func.func @transform_2(%arg0: i32) -> (i32, i32) {
    %c0_i32 = arith.constant 0 : i32
    %c0_i32_0 = arith.constant 0 : i32
    %c0_i32_1 = arith.constant 0 : i32
    return %c0_i32, %c0_i32_0 : i32, i32
  }
  func.func @transform_3(%arg0: i32) -> (i32, i32) {
    %c0_i32 = arith.constant 0 : i32
    %c0_i32_0 = arith.constant 0 : i32
    %c0_i32_1 = arith.constant 0 : i32
    return %c0_i32, %c0_i32_0 : i32, i32
  }
  func.func @transform_4(%arg0: i32) -> (i32, i32) {
    %c0_i32 = arith.constant 0 : i32
    %c0_i32_0 = arith.constant 0 : i32
    return %arg0, %c0_i32 : i32, i32
  }
}

</mosaic_0001>

<bundles_post_ra>
// kernel: tpu_custom_call.1
= control target key start
LH: loop header
LB: loop body
LE: loop exit
PB: predicated region body
PF: predicated region fallthrough
CT: control target
= control target key end

     0   :  { %9 = vsyncpa [#allocation3], 0  ;;  %s1375_s0 = inlined_call_operand.vmem [shape: f32[16,256], index: 0, kind: input, shape index: {}]   ;;  %s1376_s1 = inlined_call_operand.vmem [shape: s32[16,8], index: 1, kind: input, shape index: {}]   ;;  %s1377_s2 = inlined_call_operand.vmem [shape: bf16[256,256], index: 2, kind: input, shape index: {}]   ;;  %s1378_s3 = inlined_call_operand.vmem [shape: f32[256,8], index: 3, kind: input, shape index: {}]   ;;  %s1379_s4 = inlined_call_operand.hbm [shape: f32[16,32], index: 4, kind: output, shape index: {}]  }
   0x1   :  { %11 = vsyncpa [#allocation3 + $0x1], 0  ;;  %s1056_s15 = smov 0   ;;  %s1058_s16 = smov 0  }
   0x2   :  { %s1060_s17 = smov 0   ;;  %s1062_s18 = smov 0  }
   0x3 LB: > { %s1077_s19 = sadd.s32 4294967295, %s1017_s18   ;;  %s728_s20 = sadd.s32 4294967294, %s1017_s18   ;;  %s1017_s18 = sphi %s1062_s18, %s1385_s18   ;;  %s1013_s17 = sphi %s1060_s17, %s1384_s17   ;;  %s1009_s16 = sphi %s1058_s16, %s1383_s16   ;;  %s1005_s15 = sphi %s1056_s15, %s1382_s15  }
   0x4   : > { %s1081_s21 = sadd.s32 1, %s1017_s18   ;;  %s118_s22 = sadd.s32 1, %s1013_s17 }
   0x5   : > { %s115_s23 = ssub.s32 %s1017_s18, %s1081_s21  ;;  %p128_p0 = scmp.ne.s32.totalorder %s1013_s17, %s1009_s16 }
   0x6   : > { %p116_p1 = scmp.eq.s32.totalorder %s115_s23, 0  ;;  %p129_p2 = scmp.eq.s32.totalorder %s1077_s19, 1 }
   0x7   : > { %p134_p3 = scmp.ne.s32.totalorder %s1009_s16, %s1005_s15  ;;  %p135_p4 = scmp.eq.s32.totalorder %s728_s20, 1 }
   0x8   : > { %s1092_s24 = scalar_select %p116_p1, %s1013_s17, %s118_s22  }
   0x9   : > { %p1094_p5 = por %p129_p2, %p128_p0  ;;  %p1098_p6 = por %p135_p4, %p134_p3 }
   0xa   : > { %p731_p7 = scmp.ge.s32.totalorder %s1017_s18, 1  ;;  %p174_p8 = scmp.lt.s32.totalorder %s1017_s18, 3 }
   0xc   : > { %p175_p9 = pnand %p731_p7, %p174_p8 }
   0xd   : > { %v899_v0 = vld [vmem:[%s1377_s2 + $0x4] ss:$8 sps:$4 sm:$0xff] (!%p175_p9)   ;;  %v901_v1 = vld [vmem:[%s1377_s2] ss:$8 sps:$4 sm:$0xff] (!%p175_p9)   ;;  %v902_v2 = vld [vmem:[%s1377_s2 + $0x14] ss:$8 sps:$4 sm:$0xff] (!%p175_p9)  }
   0xe   : > { %178 = sbr.rel (%p175_p9) target bundleno = 1115 (0x45b), region = 36  ;;  %409 = vmatprep.subr.bf16.mxu0 (!%p175_p9), %v899_v0  ;;  %v904_v3 = vld [vmem:[%s1377_s2 + $0x10] ss:$8 sps:$4 sm:$0xff] (!%p175_p9)   ;;  %v905_v4 = vld [vmem:[%s1377_s2 + $0x24] ss:$8 sps:$4 sm:$0xff] (!%p175_p9)   ;;  %p204_p10 = scmp.lt.s32.totalorder (!%p175_p9), %s1077_s19, 1 }
   0xf   : > { %410 = vmatpush1.bf16.msra.mxu0 (!%p175_p9), %v901_v1  ;;  %v907_v5 = vld [vmem:[%s1377_s2 + $0x20] ss:$8 sps:$4 sm:$0xff] (!%p175_p9)   ;;  %v908_v6 = vld [vmem:[%s1377_s2 + $0x34] ss:$8 sps:$4 sm:$0xff] (!%p175_p9)   ;;  %v910_v7 = vld [vmem:[%s1377_s2 + $0x30] ss:$8 sps:$4 sm:$0xff] (!%p175_p9)  }
  0x10   : > { %411 = vmatprep.subr.bf16.mxu0 (!%p175_p9), %v902_v2  ;;  %v911_v8 = vld [vmem:[%s1377_s2 + $0x44] ss:$8 sps:$4 sm:$0xff] (!%p175_p9)   ;;  %v913_v9 = vld [vmem:[%s1377_s2 + $0x40] ss:$8 sps:$4 sm:$0xff] (!%p175_p9)   ;;  %v914_v10 = vld [vmem:[%s1377_s2 + $0x54] ss:$8 sps:$4 sm:$0xff] (!%p175_p9)  }
  0x11   : > { %v916_v11 = vld [vmem:[%s1377_s2 + $0x50] ss:$8 sps:$4 sm:$0xff] (!%p175_p9)   ;;  %v917_v12 = vld [vmem:[%s1377_s2 + $0x64] ss:$8 sps:$4 sm:$0xff] (!%p175_p9)   ;;  %v919_v13 = vld [vmem:[%s1377_s2 + $0x60] ss:$8 sps:$4 sm:$0xff] (!%p175_p9)  }
  0x12   : > { %v920_v15 = vld [vmem:[%s1377_s2 + $0x74] ss:$8 sps:$4 sm:$0xff] (!%p175_p9)   ;;  %v468_v17 = vld [vmem:[%s1378_s3 + $0x80] sm:$0xff] (!%p175_p9)  ;;  %v469_v18 = vld [vmem:[%s1378_s3 + $0x88] sm:$0xff] (!%p175_p9)  ;;  %vm557_vm1 = vcmask (!%p175_p9), 64512   ;;  %s1028_s14 = smov (!%p175_p9), 64  }
  0x13   : > { %412 = vmatpush1.bf16.msra.mxu0 (!%p175_p9), %v904_v3  ;;  %v452_v19 = vld [vmem:[%s1378_s3] sm:$0xff] (!%p175_p9)  ;;  %v808_v20 = vpack.c.bf16 (!%p175_p9), %v469_v18, %v468_v17  ;;  %v453_v21 = vld [vmem:[%s1378_s3 + $0x8] sm:$0xff] (!%p175_p9)  ;;  %v470_v22 = vld [vmem:[%s1378_s3 + $0x90] sm:$0xff] (!%p175_p9)  ;;  %s1029_s20 = smov (!%p175_p9), 32   ;;  %s201_s22 = sand.u32 (!%p175_p9), 1, %s1009_s16   ;;  %vm641_vm2 = vcmask (!%p175_p9), 261120  }
  0x14   : > { %413 = vmatprep.subr.bf16.mxu0 (!%p175_p9), %v905_v4  ;;  %v471_v23 = vld [vmem:[%s1378_s3 + $0x98] sm:$0xff] (!%p175_p9)  ;;  %v810_v24 = vpack.c.bf16 (!%p175_p9), %v453_v21, %v452_v19  ;;  %v454_v26 = vld [vmem:[%s1378_s3 + $0x10] sm:$0xff] (!%p175_p9)  ;;  %v472_v28 = vld [vmem:[%s1378_s3 + $0xa0] sm:$0xff] (!%p175_p9)  ;;  %s732_s27 = sshll.u32 (!%p175_p9), %s201_s22, 3  ;;  %s769_s28 = sshll.u32 (!%p175_p9), %s1077_s19, 7 }
  0x15   : > { %s1130_s23 = scalar_select %p204_p10, %s1077_s19, 1  ;;  %v812_v25 = vpack.c.bf16 %v471_v23, %v470_v22  ;;  %v455_v27 = vld [vmem:[%s1378_s3 + $0x18] sm:$0xff]  ;;  %809 = vmatprep.subr.bf16.mxu1 %v808_v20  ;;  %v473_v29 = vld [vmem:[%s1378_s3 + $0xa8] sm:$0xff]  ;;  %v456_v33 = vld [vmem:[%s1378_s3 + $0x20] sm:$0xff] }
  0x16   : > { %811 = vmatpush3.bf16.msra.mxu1 %v810_v24  ;;  %v814_v30 = vpack.c.bf16 %v455_v27, %v454_v26  ;;  %v922_v31 = vld [vmem:[%s1377_s2 + $0x70] ss:$8 sps:$4 sm:$0xff]   ;;  %v816_v32 = vpack.c.bf16 %v473_v29, %v472_v28  ;;  %v457_v34 = vld [vmem:[%s1378_s3 + $0x28] sm:$0xff]  ;;  %v926_v43 = vld [vmem:[%s1377_s2 + $0x94] ss:$8 sps:$4 sm:$0xff]   ;;  %s203_s29 = scalar_lea.vmem [#allocation2], %s732_s27  ;;  %s1333_s7 = scalar_lea.hbm %s1379_s4, %s769_s28 }
  0x17   : > { %414 = vmatpush1.bf16.msra.mxu0 %v907_v5  ;;  %s772_s5 = sshll.u32 %s1130_s23, 4  ;;  %813 = vmatprep.subr.bf16.mxu1 %v812_v25  ;;  %v923_v35 = vld [vmem:[%s1377_s2 + $0x84] ss:$8 sps:$4 sm:$0xff]   ;;  %v474_v36 = vld [vmem:[%s1378_s3 + $0xb0] sm:$0xff]  ;;  %v475_v37 = vld [vmem:[%s1378_s3 + $0xb8] sm:$0xff]  ;;  %v818_v38 = vpack.c.bf16 %v457_v34, %v456_v33  ;;  %s735_s9 = sshll.u32 %s1130_s23, 3 }
  0x18   : > { %415 = vmatprep.subr.bf16.mxu0 %v908_v6  ;;  %s1145_s10 = scalar_lea.vmem %s1375_s0, %s772_s5  ;;  %v925_v39 = vld [vmem:[%s1377_s2 + $0x80] ss:$8 sps:$4 sm:$0xff]   ;;  %v820_v40 = vpack.c.bf16 %v475_v37, %v474_v36  ;;  %v458_v41 = vld [vmem:[%s1378_s3 + $0x30] sm:$0xff]  ;;  %v459_v42 = vld [vmem:[%s1378_s3 + $0x38] sm:$0xff]  ;;  %s212_s13 = scalar_lea.vmem %s1376_s1, %s735_s9 }
  0x19   : > { %v1157_v14 = vld [vmem:[%s1145_s10 + $0x8] sm:$0xff]  ;;  %v476_v44 = vld [vmem:[%s1378_s3 + $0xc0] sm:$0xff]  ;;  %v822_v46 = vpack.c.bf16 %v459_v42, %v458_v41  ;;  %v928_v47 = vld [vmem:[%s1377_s2 + $0x90] ss:$8 sps:$4 sm:$0xff]   ;;  %s1027_s23 = smov 96   ;;  %s657_s30 = sshll.u32 %s203_s29, 4  ;;  %s1335_s30 = int_to_ptr.vmem [resolvable:$true] %s657_s30 }
  0x1a   : > { %v216_v16 = vpack.c.bf16 %v1157_v14, %v1157_v14  ;;  %815 = vmatpush3.bf16.msra.mxu1 %v814_v30  ;;  %v477_v45 = vld [vmem:[%s1378_s3 + $0xc8] sm:$0xff]  ;;  %v460_v49 = vld [vmem:[%s1378_s3 + $0x40] sm:$0xff]  ;;  %v932_v54 = vld [vmem:[%s1377_s2 + $0xb4] ss:$8 sps:$4 sm:$0xff]   ;;  %s955_s8 = scalar_lea.vmem %s1335_s30, 128  ;;  %s1030_s19 = smov [#allocation2]  }
  0x1b   : > { %416 = vmatpush1.bf16.msra.mxu0 %v910_v7  ;;  %817 = vmatprep.subr.bf16.mxu1 %v816_v32  ;;  %v824_v48 = vpack.c.bf16 %v477_v45, %v476_v44  ;;  %v461_v50 = vld [vmem:[%s1378_s3 + $0x48] sm:$0xff]  ;;  %v934_v55 = vld [vmem:[%s1377_s2 + $0xb0] ss:$8 sps:$4 sm:$0xff]   ;;  %v938_v58 = vld [vmem:[%s1377_s2 + $0xd4] ss:$8 sps:$4 sm:$0xff]   ;;  %v1022_v44 = vmov 7   ;;  %p956_p11 = scmp.ne.s32.totalorder %s1335_s30, %s955_s8 }
  0x1c   : > { %417 = vmatprep.subr.bf16.mxu0 %v911_v8  ;;  %441 = vmatprep.mubr.bf16.mxu0 %v216_v16  ;;  %v929_v51 = vld [vmem:[%s1377_s2 + $0xa4] ss:$8 sps:$4 sm:$0xff]   ;;  %v826_v52 = vpack.c.bf16 %v461_v50, %v460_v49  ;;  %v931_v53 = vld [vmem:[%s1377_s2 + $0xa0] ss:$8 sps:$4 sm:$0xff]   ;;  %v940_v59 = vld [vmem:[%s1377_s2 + $0xd0] ss:$8 sps:$4 sm:$0xff]  }
  0x1d   : > { %v935_v56 = vld [vmem:[%s1377_s2 + $0xc4] ss:$8 sps:$4 sm:$0xff]   ;;  %v937_v57 = vld [vmem:[%s1377_s2 + $0xc0] ss:$8 sps:$4 sm:$0xff]   ;;  %v944_v62 = vld [vmem:[%s1377_s2 + $0xf4] ss:$8 sps:$4 sm:$0xff]   ;;  %p957_p12 = pnand %p956_p11, %p1094_p5 }
  0x1e   : > { %819 = vmatpush3.bf16.msra.mxu1 %v818_v38  ;;  %v941_v60 = vld [vmem:[%s1377_s2 + $0xe4] ss:$8 sps:$4 sm:$0xff]   ;;  %v943_v61 = vld [vmem:[%s1377_s2 + $0xe0] ss:$8 sps:$4 sm:$0xff]   ;;  %v946_v63 = vld [vmem:[%s1377_s2 + $0xf0] ss:$8 sps:$4 sm:$0xff]  }
  0x1f   : > { %418 = vmatpush1.bf16.msra.mxu0 %v913_v9  ;;  %821 = vmatprep.subr.bf16.mxu1 %v820_v40  ;;  %v1276_v0 = vld [vmem:[%s1145_s10] sm:$0xff]  ;;  %v478_v2 = vld [vmem:[%s1378_s3 + $0xd0] sm:$0xff]  ;;  %v479_v3 = vld [vmem:[%s1378_s3 + $0xd8] sm:$0xff]  ;;  %v1019_v38 = vmov 3   ;;  %v1023_v45 = vmov 5   ;;  %s644_s10 = scalar_lea.sflag [#allocation3], %s201_s22  ;;  %p958_p13 = pneg %p957_p12 }
  0x20   : > { %419 = vmatprep.subr.bf16.mxu0 %v914_v10  ;;  %v215_v1 = vpack.c.bf16 %v1276_v0, %v1276_v0  ;;  %v828_v4 = vpack.c.bf16 %v479_v3, %v478_v2  ;;  %v462_v5 = vld [vmem:[%s1378_s3 + $0x50] sm:$0xff]  ;;  %v463_v6 = vld [vmem:[%s1378_s3 + $0x58] sm:$0xff]  ;;  %v480_v8 = vld [vmem:[%s1378_s3 + $0xe0] sm:$0xff]  ;;  %892 = vset.pattern.permute.xlu0 %v1019_v38  ;;  %s959_s9 = sshll.u32 %s1030_s19, 4  ;;  %s960_s9 = int_to_ptr.vmem [resolvable:$false] %s959_s9 }
  0x21   : > { %v830_v7 = vpack.c.bf16 %v463_v6, %v462_v5  ;;  %v481_v9 = vld [vmem:[%s1378_s3 + $0xe8] sm:$0xff]  ;;  %v464_v10 = vld [vmem:[%s1378_s3 + $0x60] sm:$0xff]  ;;  %v466_v18 = vld [vmem:[%s1378_s3 + $0x70] sm:$0xff]  ;;  %s961_s11 = scalar_lea.vmem %s960_s9, 256  ;;  %p962_p0 = scmp.lt.s32.totalorder %s1335_s30, %s960_s9 }
  0x22   : > { %823 = vmatpush3.bf16.msra.mxu1 %v822_v46  ;;  %v467_v19 = vld [vmem:[%s1378_s3 + $0x78] sm:$0xff]  ;;  %v554_v27 = vld [vmem:[%s212_s13] sm:$0xff]  ;;  %v1024_v46 = vmov 6   ;;  %p963_p1 = scmp.lt.s32.totalorder %s961_s11, %s955_s8 }
  0x23   : > { %420 = vmatpush1.bf16.msra.mxu0 %v916_v11  ;;  %825 = vmatprep.subr.bf16.mxu1 %v824_v48  ;;  %v832_v11 = vpack.c.bf16 %v481_v9, %v480_v8  ;;  %v838_v20 = vpack.c.bf16 %v467_v19, %v466_v18  ;;  %vm555_vm0 = vcmp.ne.s32.totalorder %v554_v27, 0  ;;  %v1026_v48 = vmov 4  }
  0x24   : > { %421 = vmatprep.subr.bf16.mxu0 %v917_v12  ;;  %v465_v12 = vld [vmem:[%s1378_s3 + $0x68] sm:$0xff]  ;;  %p964_p2 = por %p963_p1, %p962_p0 }
  0x25   : > { %v834_v16 = vpack.c.bf16 %v465_v12, %v464_v10 }
  0x26   : > { %827 = vmatpush3.bf16.msra.mxu1 %v826_v52  ;;  %p965_p3 = pnand %p964_p2, %p958_p13 }
  0x27   : > { %422 = vmatpush1.bf16.msra.mxu0 %v919_v13  ;;  %829 = vmatprep.subr.bf16.mxu1 %v828_v4  ;;  %v482_v13 = vld [vmem:[%s1378_s3 + $0xf0] sm:$0xff] }
  0x28   : > { %423 = vmatprep.subr.bf16.mxu0 %v920_v15  ;;  %v483_v15 = vld [vmem:[%s1378_s3 + $0xf8] sm:$0xff] }
  0x29   : > { %v836_v17 = vpack.c.bf16 %v483_v15, %v482_v13 }
  0x2a   : > { %831 = vmatpush3.bf16.msra.mxu1 %v830_v7 }
  0x2b   : > { %424 = vmatpush1.bf16.msra.mxu0 %v922_v31  ;;  %833 = vmatprep.subr.bf16.mxu1 %v832_v11 }
  0x2c   : > { %425 = vmatprep.subr.bf16.mxu0 %v923_v35 }
  0x2e   : > { %835 = vmatpush3.bf16.msra.mxu1 %v834_v16 }
  0x2f   : > { %426 = vmatpush1.bf16.msra.mxu0 %v925_v39  ;;  %837 = vmatprep.subr.bf16.mxu1 %v836_v17  ;;  %v1020_v39 = vmov 1  }
  0x30   : > { %427 = vmatprep.subr.bf16.mxu0 %v926_v43  ;;  %890 = vset.pattern.permute.xlu1 %v1020_v39  ;;  %v1021_v43 = vmov 2  }
  0x32   : > { %839 = vmatpush3.bf16.msra.mxu1 %v838_v20 }
  0x33   : > { %428 = vmatpush1.bf16.msra.mxu0 %v928_v47  ;;  %v1025_v47 = vmov 0  }
  0x34   : > { %429 = vmatprep.subr.bf16.mxu0 %v929_v51 }
  0x37   : > { %430 = vmatpush1.bf16.msra.mxu0 %v931_v53 }
  0x38   : > { %431 = vmatprep.subr.bf16.mxu0 %v932_v54 }
  0x3b   : > { %432 = vmatpush1.bf16.msra.mxu0 %v934_v55 }
  0x3c   : > { %433 = vmatprep.subr.bf16.mxu0 %v935_v56 }
  0x3f   : > { %434 = vmatpush1.bf16.msra.mxu0 %v937_v57 }
  0x40   : > { %435 = vmatprep.subr.bf16.mxu0 %v938_v58 }
  0x43   : > { %436 = vmatpush1.bf16.msra.mxu0 %v940_v59 }
  0x44   : > { %437 = vmatprep.subr.bf16.mxu0 %v941_v60 }
  0x47   : > { %438 = vmatpush1.bf16.msra.mxu0 %v943_v61 }
  0x48   : > { %439 = vmatprep.subr.bf16.mxu0 %v944_v62 }
  0x4b   : > { %440 = vmatpush1.bf16.msra.mxu0 %v946_v63 }
  0x4e   : > { %442 = vmatmul.mubr.bf16.vlgmr.msra.gmra.mrb[0].mxu0 %v215_v1 }
 0x121   : > { %v443_v21 = vpop.f32.mrb[0].mxu0 }
 0x122   : > { %v445_v22 = vpop.f32.mrb[1].mxu0 }
 0x123   : > { %947 = vtanh.f32 %v445_v22  ;;  %v447_v23 = vpop.f32.mrb[2].mxu0 }
 0x124   : > { %949 = vtanh.f32 %v443_v21  ;;  %v448_v24 = vpop.f32.mrb[3].mxu0 }
 0x12d   : > { %v948_v25 = vpop.eup %947 }
 0x12e   : > { %v950_v26 = vpop.eup %949  ;;  %548 = vmatprep.mubr.f32.mxu1 %v948_v25 }
 0x12f   : > { %549 = vmatmul.mubr.f32.vlgmr.msra.gmra.mrb[0].mxu1 %v950_v26 }
 0x202   : > { %v805_v28 = vpop.f32.mrb[0].mxu1 }
 0x203   : > { %v806_v29 = vpop.f32.mrb[1].mxu1 }
 0x204   : > { %v807_v30 = vadd.f32 %v806_v29, %v805_v28 }
 0x206   : > { %v556_v31 = vsel %vm555_vm0, %v807_v30, -1e+20 }
 0x207   : > { %v558_v32 = vsel %vm557_vm1, %v556_v31, -inf }
 0x208   : > { %559 = vmax.xlane.f32.xlu0 %v558_v32 }
 0x295   : > { %v560_v33 = vpop.xlane.xlu0 %559 }
 0x296   : > { %v561_v34 = vsub.f32 %v556_v31, %v560_v33 }
 0x298   : > { %v562_v35 = vmul.f32 1.442695, %v561_v34 }
 0x29a   : > { %951 = vpow2.f32 %v562_v35 }
 0x2a4   : > { %v952_v36 = vpop.eup %951 }
 0x2a5   : > { %v564_v37 = vsel %vm557_vm1, %v952_v36, 0.0 }
 0x2a6   : > { %565 = vadd.xlane.f32.xlu0 %v564_v37 }
 0x333   : > { %v566_v40 = vpop.xlane.xlu0 %565 }
 0x334   : > { %953 = vrcp.f32 %v566_v40 }
 0x33e   : > { %v954_v41 = vpop.eup %953 }
 0x33f   : > { %v568_v42 = vmul.f32 %v954_v41, %v952_v36 }
 0x341   : > { %596 = vperm.xlu0 %892, %v568_v42   ;;  %576 = vperm.xlu1 %890, %v568_v42  }
 0x345   : > { %891 = vset.pattern.permute.xlu1 %v1021_v43  ;;  %898 = vset.pattern.permute.xlu0 %v1022_v44 }
 0x346   : > { %586 = vperm.xlu1 %891, %v568_v42  }
 0x34a   : > { %893 = vset.pattern.permute.xlu1 %v1023_v45 }
 0x34b   : > { %612 = vperm.xlu1 %893, %v568_v42  }
 0x34f   : > { %894 = vset.pattern.permute.xlu1 %v1024_v46 }
 0x350   : > { %622 = vperm.xlu1 %894, %v568_v42  }
 0x354   : > { %895 = vset.pattern.permute.xlu1 %v1022_v44 }
 0x355   : > { %632 = vperm.xlu1 %895, %v568_v42  }
 0x359   : > { %896 = vset.pattern.permute.xlu1 %v1025_v47 }
 0x35a   : > { %571 = vperm.xlu1 %896, %v568_v42  }
 0x35e   : > { %897 = vset.pattern.permute.xlu1 %v1026_v48 }
 0x35f   : > { %606 = vperm.xlu1 %897, %v568_v42  }
 0x3c0   : > { %v577_v49 = vpop.permute.xlu1 %576  ;;  %v597_v53 = vpop.permute.xlu0 %596 }
 0x3c1   : > { %v579_v50 = vmul.f32 %v577_v49, %v1276_v0  ;;  %v599_v54 = vmul.f32 %v597_v53, %v1276_v0 }
 0x3c3   : > { %581 = vrot.lane.b32.xlu1 %v579_v50, %s1027_s23 }
 0x3c5   : > { %v587_v51 = vpop.permute.xlu1 %586 }
 0x3c6   : > { %v589_v52 = vmul.f32 %v587_v51, %v1276_v0 }
 0x3c8   : > { %591 = vrot.lane.b32.xlu1 %v589_v52, %s1028_s14 }
 0x3ca   : > { %v613_v55 = vpop.permute.xlu1 %612 }
 0x3cb   : > { %v615_v56 = vmul.f32 %v613_v55, %v1157_v14 }
 0x3cc   : > { %601 = vrot.lane.b32.xlu1 %v599_v54, %s1029_s20 }
 0x3cf   : > { %v623_v57 = vpop.permute.xlu1 %622 }
 0x3d0   : > { %617 = vrot.lane.b32.xlu1 %v615_v56, %s1027_s23  ;;  %v625_v58 = vmul.f32 %v623_v57, %v1157_v14 }
 0x3d4   : > { %627 = vrot.lane.b32.xlu1 %v625_v58, %s1028_s14  ;;  %v633_v59 = vpop.permute.xlu1 %632 }
 0x3d5   : > { %v635_v60 = vmul.f32 %v633_v59, %v1157_v14 }
 0x3d8   : > { %637 = vrot.lane.b32.xlu1 %v635_v60, %s1029_s20 }
 0x3d9   : > { %v572_v61 = vpop.permute.xlu1 %571 }
 0x3da   : > { %v574_v1 = vmul.f32 %v572_v61, %v1276_v0 }
 0x3de   : > { %v607_v62 = vpop.permute.xlu1 %606 }
 0x3df   : > { %v609_v7 = vmul.f32 %v607_v62, %v1157_v14 }
 0x435   : > { %v582_v63 = vpop.permute.xlu1 %581 }
 0x436   : > { %v584_v3 = vadd.f32 %v582_v63, %v574_v1 }
 0x43a   : > { %v592_v2 = vpop.permute.xlu1 %591 }
 0x43b   : > { %v594_v4 = vadd.f32 %v592_v2, %v584_v3 }
 0x43e   : > { %v602_v5 = vpop.permute.xlu1 %601 }
 0x43f   : > { %v604_v6 = vadd.f32 %v602_v5, %v594_v4 }
 0x441   : > { %v610_v9 = vadd.f32 %v609_v7, %v604_v6 }
 0x442   : > { %v618_v8 = vpop.permute.xlu1 %617 }
 0x443   : > { %v620_v11 = vadd.f32 %v618_v8, %v610_v9 }
 0x446   : > { %v628_v10 = vpop.permute.xlu1 %627 }
 0x447   : > { %v630_v12 = vadd.f32 %v628_v10, %v620_v11 }
 0x44a   : > { %v638_v13 = vpop.permute.xlu1 %637 }
 0x44b   : > { %v640_v0 = vadd.f32 %v638_v13, %v630_v12 }
 0x44d   : > { %642 = vst.msk [vmem:[%s203_s29] sm:$0xff] %vm641_vm2, %v640_v0 }
 0x44e   : > { %968 = shalt.err (!%p965_p3)
}
 0x44f   : > { %s969_s12 = scalar_lea.hbm %s1333_s7, 128  ;;  %s973_s14 = scalar_lea.hbm %s1379_s4, 256 }
 0x450   : > { %p970_p4 = scmp.ne.s32.totalorder %s1333_s7, %s969_s12  ;;  %p974_p9 = scmp.lt.u32.totalorder %s1333_s7, %s1379_s4 }
 0x451   : > { %p975_p10 = scmp.lt.u32.totalorder %s973_s14, %s969_s12  ;;  %p977_p12 = scmp.lt.u32.totalorder %s969_s12, %s1333_s7 }
 0x452   : > { %p971_p7 = pnand %p970_p4, %p1094_p5 }
 0x453   : > { %p976_p11 = por %p975_p10, %p974_p9 }
 0x454   : > { %p972_p8 = pneg %p971_p7 }
 0x455   : > { %p978_p13 = por %p977_p12, %p976_p11 }
 0x457   : > { %p979_p0 = pnand %p978_p13, %p972_p8 }
 0x459   : > { %982 = shalt.err (!%p979_p0)
}
 0x45a   : > { %840 = dma.vmem_to_hbm [thread:$0]  (%p1094_p5), %s1335_s30, 128, %s1333_s7, %s644_s10  }
 0x45b PF: > { %p846_p1 = scmp.ge.s32.totalorder %s1017_s18, 2  ;;  %s669_s27 = sand.u32 1, %s1005_s15  }
 0x45c   : > { %s670_s28 = scalar_lea.sflag [#allocation3], %s669_s27 }
 0x45d   : > { %p843_p2 = pnand %p846_p1, %p1098_p6 }
 0x45f   : > { %1000 = dma.done.wait (!%p843_p2), %s670_s28, 128  }
 0x460   : > { %1002 = vsyncadd (!%p843_p2), %s670_s28, 4294967168  ;;  %p14_p3 = scmp.ge.s32.totalorder %s1081_s21, 4   ;;  %s1382_s15 = smov %s1009_s16 }
 0x461   : > { %s1383_s16 = smov %s1013_s17  ;;  %s1384_s17 = smov %s1092_s24 }
 0x462   : > { %s1385_s18 = smov %s1081_s21  ;;  %16 = sbr.rel (!%p14_p3) target bundleno = 3 (0x3), region = 74 }
 0x469   :  { %675 = vsyncpa [#allocation3], 1 }
 0x46a   :  { %677 = vsyncpa [#allocation3 + $0x1], 1 }

</bundles_post_ra>
